<compile_context>
chip_gen: v7x
topology: tpu7x:2x2x1
jax: 0.10.0
libtpu: 0.0.40
codegen_flags: <defaults>
</compile_context>

<pallas_src>
import functools

import jax
import jax.numpy as jnp
from jax.experimental import pallas as pl
from jax.experimental.pallas import tpu as pltpu


def _round_up(x: int, m: int) -> int:
    return ((x + m - 1) // m) * m


def _dilated_residual_kernel(xpad_hbm, w3_ref, b1_ref, wp_ref, b2_ref,
                             o_ref, xwin_ref, acc_ref, sem, *,
                             dilation: int, tl: int):
    # xpad_hbm : (N, Lt + 2*d, Cp) halo-padded, channels-last, in HBM (pl.ANY)
    # w3_ref   : (3, Cp, Cp)  per-tap weights, (Cin, Cout)
    # b1_ref   : (1, Cp)
    # wp_ref   : (Cp, Cp)     1x1 conv weight, (Cin, Cout)
    # b2_ref   : (1, Cp)
    # o_ref    : (1, tl, Cp)  output tile
    # xwin_ref : (3, tl, Cp)  VMEM scratch: the three dilation-shifted input windows
    # acc_ref  : (tl, Cp)     f32 VMEM accumulator
    # sem      : DMA semaphores, shape (3,)
    n = pl.program_id(0)
    j = pl.program_id(1)
    row0 = pl.multiple_of(j * tl, 8)      # tl is a multiple of 8

    # DMA the three dilation-shifted windows (tap k reads padded rows
    # [j*tl + k*d, j*tl + k*d + tl)) from HBM into aligned VMEM slabs.
    copies = [
        pltpu.make_async_copy(
            xpad_hbm.at[n, pl.ds(row0 + k * dilation, tl), :],
            xwin_ref.at[k],
            sem.at[k],
        )
        for k in range(3)
    ]
    for c in copies:
        c.start()
    for c in copies:
        c.wait()

    # Dilated conv: three accumulating MXU matmuls into an f32 scratch.
    acc_ref[...] = jnp.dot(xwin_ref[0], w3_ref[0],
                           preferred_element_type=jnp.float32)
    acc_ref[...] += jnp.dot(xwin_ref[1], w3_ref[1],
                            preferred_element_type=jnp.float32)
    acc_ref[...] += jnp.dot(xwin_ref[2], w3_ref[2],
                            preferred_element_type=jnp.float32)

    h = jnp.maximum(acc_ref[...] + b1_ref[...], 0.0)          # bias + ReLU (f32)

    # 1x1 conv (single matmul) + bias.
    y = jnp.dot(h.astype(xwin_ref.dtype), wp_ref[...],
                preferred_element_type=jnp.float32) + b2_ref[...]

    # Dropout == identity (eval mode). Residual source == un-shifted (middle tap)
    # window, so no extra HBM read / separate residual input is needed.
    o_ref[0] = (xwin_ref[1].astype(jnp.float32) + y).astype(o_ref.dtype)


def prepare_dilated_residual_weights(conv_dilated_w, conv_dilated_b,
                                     conv_1x1_w, conv_1x1_b, cp: int):
    """Transpose + channel-pad weights once; cache/reuse across calls for stacked layers."""
    C = conv_dilated_b.shape[0]
    pad_c = cp - C
    # (Cout, Cin, 3) -> per-tap (Cin, Cout), zero-padded to (3, Cp, Cp).
    w3 = jnp.transpose(conv_dilated_w, (2, 1, 0))
    w3 = jnp.pad(w3, ((0, 0), (0, pad_c), (0, pad_c)))
    wp = jnp.pad(jnp.transpose(conv_1x1_w[:, :, 0], (1, 0)),
                 ((0, pad_c), (0, pad_c)))                     # (Cp, Cp)
    b1 = jnp.pad(conv_dilated_b, (0, pad_c)).reshape(1, cp)
    b2 = jnp.pad(conv_1x1_b, (0, pad_c)).reshape(1, cp)
    return w3, b1, wp, b2


def dilated_residual_layer_nlc(x_nlc, conv_dilated_w, conv_dilated_b,
                               conv_1x1_w, conv_1x1_b, *, dilation: int,
                               max_tile_l: int = 512):
    """Channels-last entry point. x_nlc: (N, L, C) -> (N, L, C)."""
    N, L, C = x_nlc.shape
    d = int(dilation)
    cp = _round_up(max(C, 128), 128)      # lane-dense channel width

    # ---- L tiling (generation-safe VMEM budget) -------------------------------
    n_tiles = -(-L // max_tile_l)
    tl = _round_up(-(-L // n_tiles), 8)
    # Crude budget: 3 input windows + f32 acc + double-buffered output <= ~12 MiB
    # (well inside v7x's 32 MiB scoped / 64 MiB physical VMEM).
    tl_cap = max(8, (((12 * 1024 * 1024) // (6 * cp * 4)) // 8) * 8)
    tl = min(tl, tl_cap)
    lt = _round_up(L, tl)

    # ---- one-time HBM layout work (halo + channel padding, channels-last) -----
    # Real data occupies rows [d, d + L); everything else is zeros, matching the
    # Conv1d zero padding semantics.
    xpad = jnp.pad(x_nlc, ((0, 0), (d, d + (lt - L)), (0, cp - C)))

    w3, b1, wp, b2 = prepare_dilated_residual_weights(
        conv_dilated_w, conv_dilated_b, conv_1x1_w, conv_1x1_b, cp)

    kernel = functools.partial(_dilated_residual_kernel, dilation=d, tl=tl)

    out = pl.pallas_call(
        kernel,
        out_shape=jax.ShapeDtypeStruct((N, lt, cp), x_nlc.dtype),
        grid_spec=pltpu.PrefetchScalarGridSpec(
            num_scalar_prefetch=0,
            grid=(N, lt // tl),
            in_specs=[
                pl.BlockSpec(memory_space=pl.ANY),                  # halo-padded x (HBM)
                pl.BlockSpec((3, cp, cp), lambda n, j: (0, 0, 0)),  # dilated taps
                pl.BlockSpec((1, cp),     lambda n, j: (0, 0)),     # b1
                pl.BlockSpec((cp, cp),    lambda n, j: (0, 0)),     # 1x1 weight
                pl.BlockSpec((1, cp),     lambda n, j: (0, 0)),     # b2
            ],
            out_specs=pl.BlockSpec((1, tl, cp), lambda n, j: (n, j, 0)),
            scratch_shapes=[
                pltpu.VMEM((3, tl, cp), x_nlc.dtype),   # shifted input windows
                pltpu.VMEM((tl, cp), jnp.float32),      # f32 accumulator
                pltpu.SemaphoreType.DMA((3,)),
            ],
        ),
        compiler_params=pltpu.CompilerParams(
            dimension_semantics=("parallel", "parallel"),
            vmem_limit_bytes=32 * 1024 * 1024,
        ),
    )(xpad, w3, b1, wp, b2)

    return out[:, :L, :C]


def dilated_residual_layer(x_ncl, conv_dilated_w, conv_dilated_b,
                           conv_1x1_w, conv_1x1_b, *, dilation: int):
    """PyTorch-layout wrapper: x_ncl (N, C, L) -> (N, C, L).

    For stacked DilatedResidualLayers prefer `dilated_residual_layer_nlc` and keep
    activations channels-last end-to-end (avoids two extra HBM transpose passes per layer).
    """
    N, C, L = x_ncl.shape
    assert conv_dilated_w.shape == (C, C, 3)
    assert conv_1x1_w.shape == (C, C, 1)
    x_nlc = jnp.transpose(x_ncl, (0, 2, 1))
    out_nlc = dilated_residual_layer_nlc(
        x_nlc, conv_dilated_w, conv_dilated_b, conv_1x1_w, conv_1x1_b,
        dilation=dilation)
    return jnp.transpose(out_nlc, (0, 2, 1))


def _reference(x_ncl, w3, b1, wp, b2, dilation):
    """Pure-JAX reference matching PyTorch semantics (eval-mode dropout)."""
    out = jax.lax.conv_general_dilated(
        x_ncl, w3, window_strides=(1,), padding=[(dilation, dilation)],
        rhs_dilation=(dilation,), dimension_numbers=("NCH", "OIH", "NCH"))
    out = out + b1[None, :, None]
    out = jnp.maximum(out, 0.0)
    out = jnp.einsum("ncl,oc->nol", out, wp[:, :, 0]) + b2[None, :, None]
    return x_ncl + out


if __name__ == "__main__":
    N, C, L = 2, 4, 16
    dilation = 2

    key = jax.random.PRNGKey(0)
    k_x, k_w1, k_b1, k_w2, k_b2 = jax.random.split(key, 5)

    x = jax.random.normal(k_x, (N, C, L), dtype=jnp.float32)
    conv_dilated_w = jax.random.normal(k_w1, (C, C, 3), dtype=jnp.float32) * 0.3
    conv_dilated_b = jax.random.normal(k_b1, (C,), dtype=jnp.float32) * 0.1
    conv_1x1_w = jax.random.normal(k_w2, (C, C, 1), dtype=jnp.float32) * 0.3
    conv_1x1_b = jax.random.normal(k_b2, (C,), dtype=jnp.float32) * 0.1

    out = dilated_residual_layer(x, conv_dilated_w, conv_dilated_b,
                                 conv_1x1_w, conv_1x1_b, dilation=dilation)
    out = jax.block_until_ready(out)

    ref = _reference(x, conv_dilated_w, conv_dilated_b,
                     conv_1x1_w, conv_1x1_b, dilation)
    assert out.shape == (N, C, L)
    assert jnp.allclose(out, ref, atol=2e-5, rtol=2e-5), "mismatch vs reference"

    print("KERNEL_OK")
</pallas_src>

<mosaic_0001>
module attributes {stable_mosaic.version = 11 : i64} {
  func.func @_dilated_residual_kernel(%arg0: i32, %arg1: i32, %arg2: memref<2x20x128xf32, #tpu.memory_space<any>>, %arg3: memref<3x128x128xf32, #tpu.memory_space<vmem>>, %arg4: memref<1x128xf32, #tpu.memory_space<vmem>>, %arg5: memref<128x128xf32, #tpu.memory_space<vmem>>, %arg6: memref<1x128xf32, #tpu.memory_space<vmem>>, %arg7: memref<1x16x128xf32, #tpu.memory_space<vmem>>, %arg8: memref<3x16x128xf32, #tpu.memory_space<vmem>>, %arg9: memref<16x128xf32, #tpu.memory_space<vmem>>, %arg10: memref<3x!tpu.dma_semaphore, #tpu.memory_space<semaphore_mem>>) attributes {dimension_semantics = [#tpu.dimension_semantics<parallel>, #tpu.dimension_semantics<parallel>], iteration_bounds = array<i64: 2, 1>, scalar_prefetch = 0 : i64, scratch_operands = 3 : i64, tpu.core_type = #tpu.core_type<tc>, window_params = [{}, {pipeline_mode = #tpu.pipeline_mode<synchronous>, transform_indices = @transform_1, window_bounds = array<i64: 3, 128, 128>}, {pipeline_mode = #tpu.pipeline_mode<synchronous>, transform_indices = @transform_2, window_bounds = array<i64: 1, 128>}, {pipeline_mode = #tpu.pipeline_mode<synchronous>, transform_indices = @transform_3, window_bounds = array<i64: 128, 128>}, {pipeline_mode = #tpu.pipeline_mode<synchronous>, transform_indices = @transform_4, window_bounds = array<i64: 1, 128>}, {transform_indices = @transform_5, window_bounds = array<i64: 1, 16, 128>}]} {
    %c16_i32 = arith.constant 16 : i32
    %0 = arith.muli %arg1, %c16_i32 : i32
    %1 = tpu.assume_multiple %0, 8 : i32
    %c0_i32 = arith.constant 0 : i32
    %2 = arith.addi %1, %c0_i32 : i32
    %c2_i32 = arith.constant 2 : i32
    %3 = arith.addi %1, %c2_i32 : i32
    %c4_i32 = arith.constant 4 : i32
    %4 = arith.addi %1, %c4_i32 : i32
    %c0_i32_0 = arith.constant 0 : i32
    %c0_i32_1 = arith.constant 0 : i32
    %c0_i32_2 = arith.constant 0 : i32
    %5 = tpu.memref_slice %arg2[%arg0, %2, %c0_i32_2] : memref<2x20x128xf32, #tpu.memory_space<any>> -> memref<1x16x128xf32, #tpu.memory_space<any>>
    %6 = tpu.memref_squeeze %5 : memref<1x16x128xf32, #tpu.memory_space<any>> -> memref<16x128xf32, #tpu.memory_space<any>>
    %c0_i32_3 = arith.constant 0 : i32
    %c0_i32_4 = arith.constant 0 : i32
    %7 = tpu.memref_slice %arg8[%c0_i32_0, %c0_i32_3, %c0_i32_4] : memref<3x16x128xf32, #tpu.memory_space<vmem>> -> memref<1x16x128xf32, #tpu.memory_space<vmem>>
    %8 = tpu.memref_squeeze %7 : memref<1x16x128xf32, #tpu.memory_space<vmem>> -> memref<16x128xf32, #tpu.memory_space<vmem>>
    %9 = tpu.memref_slice %arg10[%c0_i32_1] : memref<3x!tpu.dma_semaphore, #tpu.memory_space<semaphore_mem>> -> memref<1x!tpu.dma_semaphore, #tpu.memory_space<semaphore_mem>>
    %10 = tpu.memref_squeeze %9 : memref<1x!tpu.dma_semaphore, #tpu.memory_space<semaphore_mem>> -> memref<!tpu.dma_semaphore, #tpu.memory_space<semaphore_mem>>
    tpu.enqueue_dma source(%6 : memref<16x128xf32, #tpu.memory_space<any>>) target(%8 : memref<16x128xf32, #tpu.memory_space<vmem>>) target_semaphore(%10 : memref<!tpu.dma_semaphore, #tpu.memory_space<semaphore_mem>>)
    %c1_i32 = arith.constant 1 : i32
    %c1_i32_5 = arith.constant 1 : i32
    %c0_i32_6 = arith.constant 0 : i32
    %11 = tpu.memref_slice %arg2[%arg0, %3, %c0_i32_6] : memref<2x20x128xf32, #tpu.memory_space<any>> -> memref<1x16x128xf32, #tpu.memory_space<any>>
    %12 = tpu.memref_squeeze %11 : memref<1x16x128xf32, #tpu.memory_space<any>> -> memref<16x128xf32, #tpu.memory_space<any>>
    %c0_i32_7 = arith.constant 0 : i32
    %c0_i32_8 = arith.constant 0 : i32
    %13 = tpu.memref_slice %arg8[%c1_i32, %c0_i32_7, %c0_i32_8] : memref<3x16x128xf32, #tpu.memory_space<vmem>> -> memref<1x16x128xf32, #tpu.memory_space<vmem>>
    %14 = tpu.memref_squeeze %13 : memref<1x16x128xf32, #tpu.memory_space<vmem>> -> memref<16x128xf32, #tpu.memory_space<vmem>>
    %15 = tpu.memref_slice %arg10[%c1_i32_5] : memref<3x!tpu.dma_semaphore, #tpu.memory_space<semaphore_mem>> -> memref<1x!tpu.dma_semaphore, #tpu.memory_space<semaphore_mem>>
    %16 = tpu.memref_squeeze %15 : memref<1x!tpu.dma_semaphore, #tpu.memory_space<semaphore_mem>> -> memref<!tpu.dma_semaphore, #tpu.memory_space<semaphore_mem>>
    tpu.enqueue_dma source(%12 : memref<16x128xf32, #tpu.memory_space<any>>) target(%14 : memref<16x128xf32, #tpu.memory_space<vmem>>) target_semaphore(%16 : memref<!tpu.dma_semaphore, #tpu.memory_space<semaphore_mem>>)
    %c2_i32_9 = arith.constant 2 : i32
    %c2_i32_10 = arith.constant 2 : i32
    %c0_i32_11 = arith.constant 0 : i32
    %17 = tpu.memref_slice %arg2[%arg0, %4, %c0_i32_11] : memref<2x20x128xf32, #tpu.memory_space<any>> -> memref<1x16x128xf32, #tpu.memory_space<any>>
    %18 = tpu.memref_squeeze %17 : memref<1x16x128xf32, #tpu.memory_space<any>> -> memref<16x128xf32, #tpu.memory_space<any>>
    %c0_i32_12 = arith.constant 0 : i32
    %c0_i32_13 = arith.constant 0 : i32
    %19 = tpu.memref_slice %arg8[%c2_i32_9, %c0_i32_12, %c0_i32_13] : memref<3x16x128xf32, #tpu.memory_space<vmem>> -> memref<1x16x128xf32, #tpu.memory_space<vmem>>
    %20 = tpu.memref_squeeze %19 : memref<1x16x128xf32, #tpu.memory_space<vmem>> -> memref<16x128xf32, #tpu.memory_space<vmem>>
    %21 = tpu.memref_slice %arg10[%c2_i32_10] : memref<3x!tpu.dma_semaphore, #tpu.memory_space<semaphore_mem>> -> memref<1x!tpu.dma_semaphore, #tpu.memory_space<semaphore_mem>>
    %22 = tpu.memref_squeeze %21 : memref<1x!tpu.dma_semaphore, #tpu.memory_space<semaphore_mem>> -> memref<!tpu.dma_semaphore, #tpu.memory_space<semaphore_mem>>
    tpu.enqueue_dma source(%18 : memref<16x128xf32, #tpu.memory_space<any>>) target(%20 : memref<16x128xf32, #tpu.memory_space<vmem>>) target_semaphore(%22 : memref<!tpu.dma_semaphore, #tpu.memory_space<semaphore_mem>>)
    %c0_i32_14 = arith.constant 0 : i32
    %c0_i32_15 = arith.constant 0 : i32
    %c0_i32_16 = arith.constant 0 : i32
    %23 = tpu.memref_slice %arg2[%arg0, %2, %c0_i32_16] : memref<2x20x128xf32, #tpu.memory_space<any>> -> memref<1x16x128xf32, #tpu.memory_space<any>>
    %24 = tpu.memref_squeeze %23 : memref<1x16x128xf32, #tpu.memory_space<any>> -> memref<16x128xf32, #tpu.memory_space<any>>
    %c0_i32_17 = arith.constant 0 : i32
    %c0_i32_18 = arith.constant 0 : i32
    %25 = tpu.memref_slice %arg8[%c0_i32_14, %c0_i32_17, %c0_i32_18] : memref<3x16x128xf32, #tpu.memory_space<vmem>> -> memref<1x16x128xf32, #tpu.memory_space<vmem>>
    %26 = tpu.memref_squeeze %25 : memref<1x16x128xf32, #tpu.memory_space<vmem>> -> memref<16x128xf32, #tpu.memory_space<vmem>>
    %27 = tpu.memref_slice %arg10[%c0_i32_15] : memref<3x!tpu.dma_semaphore, #tpu.memory_space<semaphore_mem>> -> memref<1x!tpu.dma_semaphore, #tpu.memory_space<semaphore_mem>>
    %28 = tpu.memref_squeeze %27 : memref<1x!tpu.dma_semaphore, #tpu.memory_space<semaphore_mem>> -> memref<!tpu.dma_semaphore, #tpu.memory_space<semaphore_mem>>
    tpu.wait_dma2 semaphore(%28 : memref<!tpu.dma_semaphore, #tpu.memory_space<semaphore_mem>>) src(%24 : memref<16x128xf32, #tpu.memory_space<any>>) dst(%26 : memref<16x128xf32, #tpu.memory_space<vmem>>)
    %c1_i32_19 = arith.constant 1 : i32
    %c1_i32_20 = arith.constant 1 : i32
    %c0_i32_21 = arith.constant 0 : i32
    %29 = tpu.memref_slice %arg2[%arg0, %3, %c0_i32_21] : memref<2x20x128xf32, #tpu.memory_space<any>> -> memref<1x16x128xf32, #tpu.memory_space<any>>
    %30 = tpu.memref_squeeze %29 : memref<1x16x128xf32, #tpu.memory_space<any>> -> memref<16x128xf32, #tpu.memory_space<any>>
    %c0_i32_22 = arith.constant 0 : i32
    %c0_i32_23 = arith.constant 0 : i32
    %31 = tpu.memref_slice %arg8[%c1_i32_19, %c0_i32_22, %c0_i32_23] : memref<3x16x128xf32, #tpu.memory_space<vmem>> -> memref<1x16x128xf32, #tpu.memory_space<vmem>>
    %32 = tpu.memref_squeeze %31 : memref<1x16x128xf32, #tpu.memory_space<vmem>> -> memref<16x128xf32, #tpu.memory_space<vmem>>
    %33 = tpu.memref_slice %arg10[%c1_i32_20] : memref<3x!tpu.dma_semaphore, #tpu.memory_space<semaphore_mem>> -> memref<1x!tpu.dma_semaphore, #tpu.memory_space<semaphore_mem>>
    %34 = tpu.memref_squeeze %33 : memref<1x!tpu.dma_semaphore, #tpu.memory_space<semaphore_mem>> -> memref<!tpu.dma_semaphore, #tpu.memory_space<semaphore_mem>>
    tpu.wait_dma2 semaphore(%34 : memref<!tpu.dma_semaphore, #tpu.memory_space<semaphore_mem>>) src(%30 : memref<16x128xf32, #tpu.memory_space<any>>) dst(%32 : memref<16x128xf32, #tpu.memory_space<vmem>>)
    %c2_i32_24 = arith.constant 2 : i32
    %c2_i32_25 = arith.constant 2 : i32
    %c0_i32_26 = arith.constant 0 : i32
    %35 = tpu.memref_slice %arg2[%arg0, %4, %c0_i32_26] : memref<2x20x128xf32, #tpu.memory_space<any>> -> memref<1x16x128xf32, #tpu.memory_space<any>>
    %36 = tpu.memref_squeeze %35 : memref<1x16x128xf32, #tpu.memory_space<any>> -> memref<16x128xf32, #tpu.memory_space<any>>
    %c0_i32_27 = arith.constant 0 : i32
    %c0_i32_28 = arith.constant 0 : i32
    %37 = tpu.memref_slice %arg8[%c2_i32_24, %c0_i32_27, %c0_i32_28] : memref<3x16x128xf32, #tpu.memory_space<vmem>> -> memref<1x16x128xf32, #tpu.memory_space<vmem>>
    %38 = tpu.memref_squeeze %37 : memref<1x16x128xf32, #tpu.memory_space<vmem>> -> memref<16x128xf32, #tpu.memory_space<vmem>>
    %39 = tpu.memref_slice %arg10[%c2_i32_25] : memref<3x!tpu.dma_semaphore, #tpu.memory_space<semaphore_mem>> -> memref<1x!tpu.dma_semaphore, #tpu.memory_space<semaphore_mem>>
    %40 = tpu.memref_squeeze %39 : memref<1x!tpu.dma_semaphore, #tpu.memory_space<semaphore_mem>> -> memref<!tpu.dma_semaphore, #tpu.memory_space<semaphore_mem>>
    tpu.wait_dma2 semaphore(%40 : memref<!tpu.dma_semaphore, #tpu.memory_space<semaphore_mem>>) src(%36 : memref<16x128xf32, #tpu.memory_space<any>>) dst(%38 : memref<16x128xf32, #tpu.memory_space<vmem>>)
    %c0 = arith.constant 0 : index
    %c0_29 = arith.constant 0 : index
    %c0_30 = arith.constant 0 : index
    %41 = vector.load %arg8[%c0, %c0_29, %c0_30] : memref<3x16x128xf32, #tpu.memory_space<vmem>>, vector<1x16x128xf32>
    %42 = vector.shape_cast %41 : vector<1x16x128xf32> to vector<16x128xf32>
    %c0_31 = arith.constant 0 : index
    %c0_32 = arith.constant 0 : index
    %c0_33 = arith.constant 0 : index
    %43 = vector.load %arg3[%c0_31, %c0_32, %c0_33] : memref<3x128x128xf32, #tpu.memory_space<vmem>>, vector<1x128x128xf32>
    %44 = vector.shape_cast %43 : vector<1x128x128xf32> to vector<128x128xf32>
    %cst = arith.constant dense<0.000000e+00> : vector<16x128xf32>
    %45 = tpu.matmul %42, %44, %cst {dimension_numbers = #tpu.dot_dimension_numbers<[1], [0], [0], [1], [0, 0, 1, 1], [], []>} : vector<16x128xf32>, vector<128x128xf32>, vector<16x128xf32> -> vector<16x128xf32>
    %c0_34 = arith.constant 0 : index
    %c0_35 = arith.constant 0 : index
    %46 = vector.load %arg9[%c0_34, %c0_35] : memref<16x128xf32, #tpu.memory_space<vmem>>, vector<16x128xf32>
    tpu.vector_store %arg9[%c0_34, %c0_35], %45 {strides = array<i32>} : memref<16x128xf32, #tpu.memory_space<vmem>>, vector<16x128xf32>,
    %c0_36 = arith.constant 0 : index
    %c0_37 = arith.constant 0 : index
    %47 = vector.load %arg9[%c0_36, %c0_37] : memref<16x128xf32, #tpu.memory_space<vmem>>, vector<16x128xf32>
    %c1 = arith.constant 1 : index
    %c0_38 = arith.constant 0 : index
    %c0_39 = arith.constant 0 : index
    %48 = vector.load %arg8[%c1, %c0_38, %c0_39] : memref<3x16x128xf32, #tpu.memory_space<vmem>>, vector<1x16x128xf32>
    %49 = vector.shape_cast %48 : vector<1x16x128xf32> to vector<16x128xf32>
    %c1_40 = arith.constant 1 : index
    %c0_41 = arith.constant 0 : index
    %c0_42 = arith.constant 0 : index
    %50 = vector.load %arg3[%c1_40, %c0_41, %c0_42] : memref<3x128x128xf32, #tpu.memory_space<vmem>>, vector<1x128x128xf32>
    %51 = vector.shape_cast %50 : vector<1x128x128xf32> to vector<128x128xf32>
    %cst_43 = arith.constant dense<0.000000e+00> : vector<16x128xf32>
    %52 = tpu.matmul %49, %51, %cst_43 {dimension_numbers = #tpu.dot_dimension_numbers<[1], [0], [0], [1], [0, 0, 1, 1], [], []>} : vector<16x128xf32>, vector<128x128xf32>, vector<16x128xf32> -> vector<16x128xf32>
    %53 = arith.addf %47, %52 : vector<16x128xf32>
    %c0_44 = arith.constant 0 : index
    %c0_45 = arith.constant 0 : index
    %54 = vector.load %arg9[%c0_44, %c0_45] : memref<16x128xf32, #tpu.memory_space<vmem>>, vector<16x128xf32>
    tpu.vector_store %arg9[%c0_44, %c0_45], %53 {strides = array<i32>} : memref<16x128xf32, #tpu.memory_space<vmem>>, vector<16x128xf32>,
    %c0_46 = arith.constant 0 : index
    %c0_47 = arith.constant 0 : index
    %55 = vector.load %arg9[%c0_46, %c0_47] : memref<16x128xf32, #tpu.memory_space<vmem>>, vector<16x128xf32>
    %c2 = arith.constant 2 : index
    %c0_48 = arith.constant 0 : index
    %c0_49 = arith.constant 0 : index
    %56 = vector.load %arg8[%c2, %c0_48, %c0_49] : memref<3x16x128xf32, #tpu.memory_space<vmem>>, vector<1x16x128xf32>
    %57 = vector.shape_cast %56 : vector<1x16x128xf32> to vector<16x128xf32>
    %c2_50 = arith.constant 2 : index
    %c0_51 = arith.constant 0 : index
    %c0_52 = arith.constant 0 : index
    %58 = vector.load %arg3[%c2_50, %c0_51, %c0_52] : memref<3x128x128xf32, #tpu.memory_space<vmem>>, vector<1x128x128xf32>
    %59 = vector.shape_cast %58 : vector<1x128x128xf32> to vector<128x128xf32>
    %cst_53 = arith.constant dense<0.000000e+00> : vector<16x128xf32>
    %60 = tpu.matmul %57, %59, %cst_53 {dimension_numbers = #tpu.dot_dimension_numbers<[1], [0], [0], [1], [0, 0, 1, 1], [], []>} : vector<16x128xf32>, vector<128x128xf32>, vector<16x128xf32> -> vector<16x128xf32>
    %61 = arith.addf %55, %60 : vector<16x128xf32>
    %c0_54 = arith.constant 0 : index
    %c0_55 = arith.constant 0 : index
    %62 = vector.load %arg9[%c0_54, %c0_55] : memref<16x128xf32, #tpu.memory_space<vmem>>, vector<16x128xf32>
    tpu.vector_store %arg9[%c0_54, %c0_55], %61 {strides = array<i32>} : memref<16x128xf32, #tpu.memory_space<vmem>>, vector<16x128xf32>,
    %c0_56 = arith.constant 0 : index
    %c0_57 = arith.constant 0 : index
    %63 = vector.load %arg9[%c0_56, %c0_57] : memref<16x128xf32, #tpu.memory_space<vmem>>, vector<16x128xf32>
    %c0_58 = arith.constant 0 : index
    %c0_59 = arith.constant 0 : index
    %64 = vector.load %arg4[%c0_58, %c0_59] : memref<1x128xf32, #tpu.memory_space<vmem>>, vector<1x128xf32>
    %65 = vector.broadcast %64 : vector<1x128xf32> to vector<16x128xf32>
    %66 = arith.addf %63, %65 : vector<16x128xf32>
    %cst_60 = arith.constant 0.000000e+00 : f32
    %67 = vector.broadcast %cst_60 : f32 to vector<16x128xf32>
    %68 = arith.maximumf %66, %67 : vector<16x128xf32>
    %c0_61 = arith.constant 0 : index
    %c0_62 = arith.constant 0 : index
    %69 = vector.load %arg5[%c0_61, %c0_62] : memref<128x128xf32, #tpu.memory_space<vmem>>, vector<128x128xf32>
    %cst_63 = arith.constant dense<0.000000e+00> : vector<16x128xf32>
    %70 = tpu.matmul %68, %69, %cst_63 {dimension_numbers = #tpu.dot_dimension_numbers<[1], [0], [0], [1], [0, 0, 1, 1], [], []>} : vector<16x128xf32>, vector<128x128xf32>, vector<16x128xf32> -> vector<16x128xf32>
    %c0_64 = arith.constant 0 : index
    %c0_65 = arith.constant 0 : index
    %71 = vector.load %arg6[%c0_64, %c0_65] : memref<1x128xf32, #tpu.memory_space<vmem>>, vector<1x128xf32>
    %72 = vector.broadcast %71 : vector<1x128xf32> to vector<16x128xf32>
    %73 = arith.addf %70, %72 : vector<16x128xf32>
    %c1_66 = arith.constant 1 : index
    %c0_67 = arith.constant 0 : index
    %c0_68 = arith.constant 0 : index
    %74 = vector.load %arg8[%c1_66, %c0_67, %c0_68] : memref<3x16x128xf32, #tpu.memory_space<vmem>>, vector<1x16x128xf32>
    %75 = vector.shape_cast %74 : vector<1x16x128xf32> to vector<16x128xf32>
    %76 = arith.addf %75, %73 : vector<16x128xf32>
    %c0_69 = arith.constant 0 : index
    %c0_70 = arith.constant 0 : index
    %c0_71 = arith.constant 0 : index
    %77 = vector.load %arg7[%c0_69, %c0_70, %c0_71] : memref<1x16x128xf32, #tpu.memory_space<vmem>>, vector<1x16x128xf32>
    %78 = vector.shape_cast %77 : vector<1x16x128xf32> to vector<16x128xf32>
    %79 = vector.shape_cast %76 : vector<16x128xf32> to vector<1x16x128xf32>
    tpu.vector_store %arg7[%c0_69, %c0_70, %c0_71], %79 {strides = array<i32>} : memref<1x16x128xf32, #tpu.memory_space<vmem>>, vector<1x16x128xf32>,
    return
  }
  func.func @transform_1(%arg0: i32, %arg1: i32) -> (i32, i32, i32) {
    %c0_i32 = arith.constant 0 : i32
    %c0_i32_0 = arith.constant 0 : i32
    %c0_i32_1 = arith.constant 0 : i32
    %c0_i32_2 = arith.constant 0 : i32
    return %c0_i32, %c0_i32_0, %c0_i32_1 : i32, i32, i32
  }
  func.func @transform_2(%arg0: i32, %arg1: i32) -> (i32, i32) {
    %c0_i32 = arith.constant 0 : i32
    %c0_i32_0 = arith.constant 0 : i32
    %c0_i32_1 = arith.constant 0 : i32
    return %c0_i32, %c0_i32_0 : i32, i32
  }
  func.func @transform_3(%arg0: i32, %arg1: i32) -> (i32, i32) {
    %c0_i32 = arith.constant 0 : i32
    %c0_i32_0 = arith.constant 0 : i32
    %c0_i32_1 = arith.constant 0 : i32
    return %c0_i32, %c0_i32_0 : i32, i32
  }
  func.func @transform_4(%arg0: i32, %arg1: i32) -> (i32, i32) {
    %c0_i32 = arith.constant 0 : i32
    %c0_i32_0 = arith.constant 0 : i32
    %c0_i32_1 = arith.constant 0 : i32
    return %c0_i32, %c0_i32_0 : i32, i32
  }
  func.func @transform_5(%arg0: i32, %arg1: i32) -> (i32, i32, i32) {
    %c0_i32 = arith.constant 0 : i32
    %c0_i32_0 = arith.constant 0 : i32
    return %arg0, %arg1, %c0_i32 : i32, i32, i32
  }
}

</mosaic_0001>

<bundles_post_ra>
// kernel: tpu_custom_call.1
= control target key start
LH: loop header
LB: loop body
LE: loop exit
PB: predicated region body
PF: predicated region fallthrough
CT: control target
= control target key end

     0   :  { %10 = vsyncpa [#allocation6], 0  ;;  %s1802_s0 = inlined_call_operand.vmem [shape: f32[2,20,128], index: 0, kind: input, shape index: {}]   ;;  %s1803_s1 = inlined_call_operand.hbm [shape: f32[3,128,128], index: 1, kind: input, shape index: {}]   ;;  %s1804_s2 = inlined_call_operand.vmem [shape: f32[1,128], index: 2, kind: input, shape index: {}]   ;;  %s1805_s3 = inlined_call_operand.hbm [shape: f32[128,128], index: 3, kind: input, shape index: {}]   ;;  %s1806_s4 = inlined_call_operand.vmem [shape: f32[1,128], index: 4, kind: input, shape index: {}]   ;;  %s1807_s5 = inlined_call_operand.hbm [shape: f32[2,16,128], index: 5, kind: output, shape index: {}]  }
   0x1   :  { %11 = vsyncpa [#allocation9], 0 }
   0x2   :  { %12 = vsyncpa [#allocation7], 0 }
   0x3   :  { %14 = vsyncpa [#allocation7 + $0x1], 0  ;;  %s1581_s18 = smov 0   ;;  %s1583_s19 = smov 0  }
   0x4   :  { %s1585_s20 = smov 0   ;;  %s1587_s21 = smov 0  }
   0x5   :  { %s1589_s22 = smov 0   ;;  %s1591_s23 = smov 0  }
   0x6 LB: > { %s944_s24 = sadd.s32 4294967295, %s1542_s23   ;;  %s945_s25 = sadd.s32 4294967294, %s1542_s23   ;;  %s1542_s23 = sphi %s1591_s23, %s20_s23   ;;  %s1538_s22 = sphi %s1589_s22, %s1828_s22   ;;  %s1534_s21 = sphi %s1587_s21, %s1827_s21   ;;  %s1530_s20 = sphi %s1585_s20, %s1826_s20   ;;  %s1526_s19 = sphi %s1583_s19, %s1825_s19   ;;  %s1522_s18 = sphi %s1581_s18, %s1824_s18  }
   0x7   : > { %s32_s26 = sadd.s32 1, %s1538_s22  ;;  %s125_s27 = sadd.s32 1, %s1530_s20 }
   0x8   : > { %p34_p0 = scmp.ge.s32.totalorder %s32_s26, 2  ;;  %p135_p1 = scmp.ne.s32.totalorder %s1530_s20, %s1526_s19 }
   0x9   : > { %p136_p2 = scmp.eq.s32.totalorder %s944_s24, 1  ;;  %p141_p3 = scmp.ne.s32.totalorder %s1526_s19, %s1522_s18 }
   0xa   : > { %s1830_s26 = smov (%p34_p0, %s32_s26), 0  ;;  %p142_p5 = scmp.eq.s32.totalorder %s945_s25, 1 }
   0xb   : > { %1813 = sst [smem:[#allocation20_spill]] %s1830_s26  ;;  %p1621_p4 = por %p136_p2, %p135_p1 }
   0xc   : > { %s120_s29 = ssub.s32 %s1538_s22, %s1830_s26  ;;  %p946_p6 = scmp.ge.s32.totalorder %s1542_s23, 1 }
   0xd   : > { %s1814_s28 = scalar_select %p1621_p4, 1, 0 }
   0xe   : > { %p123_p7 = scmp.eq.s32.totalorder %s120_s29, 0  ;;  %p1628_p8 = por %p142_p5, %p141_p3 }
   0xf   : > { %p149_p9 = scmp.lt.s32.totalorder %s1542_s23, 3  ;;  %p1640_p11 = scmp.eq.s32.totalorder %s944_s24, 0 }
  0x10   : > { %s1815_s30 = scalar_select %p1628_p8, 1, 0 }
  0x11   : > { %s1634_s6 = scalar_select %p123_p7, %s1530_s20, %s125_s27  }
  0x12   : > { %p1636_p10 = pnand %p946_p6, %p149_p9  ;;  %s1544_s9 = smov [#allocation5]  }
  0x13   : > { %s1817_s8 = scalar_select %p1640_p11, 1, 0 }
  0x14   : > { %s1816_s7 = scalar_select %p1636_p10, 1, 0 }
  0x15   : > { %p1324_p12 = pneg %p1636_p10  ;;  %s161_s10 = sshll.u32 %s1544_s9, 4  ;;  %s162_s10 = int_to_ptr.vmem [resolvable:$true] %s161_s10 }
  0x16   : > { %s1545_s12 = smov [#allocation8]   ;;  %s1394_s16 = scalar_lea.hbm %s1803_s1, 6144 }
  0x17   : > { %p1648_p13 = pnand %p1640_p11, %p1324_p12  ;;  %s177_s13 = sshll.u32 %s1545_s12, 4  ;;  %s1652_s13 = int_to_ptr.vmem [resolvable:$true] %s177_s13 }
  0x18   : > { %p1395_p0 = scmp.ne.s32.totalorder %s1803_s1, %s1394_s16  ;;  %p1401_p5 = scmp.lt.u32.totalorder %s1394_s16, %s1803_s1 }
  0x19   : > { %p1396_p1 = pneg %p1648_p13 }
  0x1b   : > { %p1397_p2 = pnand %p1396_p1, %p1395_p0 }
  0x1d   : > { %p1398_p3 = pneg %p1397_p2 }
  0x1f   : > { %p1403_p6 = pnand %p1401_p5, %p1398_p3 }
  0x21   : > { %1406 = shalt.err (!%p1403_p6)
}
  0x22   : > { %s1407_s29 = scalar_lea.vmem %s162_s10, 6144  ;;  %p1415_p8 = scmp.lt.s32.totalorder %s162_s10, %s162_s10 }
  0x23   : > { %p1408_p7 = scmp.ne.s32.totalorder %s162_s10, %s1407_s29  ;;  %p1416_p4 = scmp.lt.s32.totalorder %s1407_s29, %s1407_s29 }
  0x25   : > { %p1410_p9 = pnand %p1408_p7, %p1396_p1  ;;  %p1417_p11 = por %p1416_p4, %p1415_p8 }
  0x27   : > { %p1411_p12 = pneg %p1410_p9 }
  0x29   : > { %p1418_p10 = pnand %p1417_p11, %p1411_p12 }
  0x2b   : > { %1421 = shalt.err (!%p1418_p10)
}
  0x2c   : > { %s1546_s9 = smov 128   ;;  %s1547_s12 = smov 8  }
  0x2d   : > { %1327 = dma.hbm_to_vmem [thread:$0]  (!%p1648_p13), %s1803_s1, 6144, %s162_s10, [#allocation6], %s1546_s9, %s1546_s9, %s1547_s12  }
  0x2e   : > { %s1422_s24 = scalar_lea.hbm %s1805_s3, 2048 }
  0x2f   : > { %p1423_p0 = scmp.ne.s32.totalorder %s1805_s3, %s1422_s24  ;;  %p1429_p10 = scmp.lt.u32.totalorder %s1422_s24, %s1805_s3 }
  0x31   : > { %p1425_p4 = pnand %p1423_p0, %p1396_p1 }
  0x33   : > { %p1426_p8 = pneg %p1425_p4 }
  0x35   : > { %p1431_p11 = pnand %p1429_p10, %p1426_p8 }
  0x37   : > { %1434 = shalt.err (!%p1431_p11)
}
  0x38   : > { %s1435_s10 = scalar_lea.vmem %s1652_s13, 2048  ;;  %p1443_p6 = scmp.lt.s32.totalorder %s1652_s13, %s1652_s13 }
  0x39   : > { %p1436_p2 = scmp.ne.s32.totalorder %s1652_s13, %s1435_s10  ;;  %p1444_p7 = scmp.lt.s32.totalorder %s1435_s10, %s1435_s10 }
  0x3b   : > { %p1438_p3 = pnand %p1436_p2, %p1396_p1  ;;  %p1445_p9 = por %p1444_p7, %p1443_p6 }
  0x3d   : > { %p1439_p5 = pneg %p1438_p3 }
  0x3f   : > { %p1446_p12 = pnand %p1445_p9, %p1439_p5 }
  0x41   : > { %1449 = shalt.err (!%p1446_p12)
}
  0x42   : > { %1330 = dma.hbm_to_vmem [thread:$0]  (!%p1648_p13), %s1805_s3, 2048, %s1652_s13, [#allocation9], %s1546_s9, %s1546_s9, %s1547_s12  }
  0x43   : > { %p1819_p0 = scmp.ne.s32.totalorder %s1816_s7, 0 }
  0x44   : > { %p1820_p4 = scmp.ne.s32.totalorder (!%p1819_p0), %s1817_s8, 0 }
  0x45   : > { %196 = sbr.rel (%p1819_p0) target bundleno = 610 (0x262), region = 36 }
  0x4c   : > { %1503 = dma.done.wait (%p1820_p4), [#allocation6], 6144  }
  0x4d   : > { %1505 = vsyncadd (%p1820_p4), [#allocation6], 4294961152 }
  0x4e   : > { %1507 = dma.done.wait (%p1820_p4), [#allocation9], 2048  }
  0x4f   : > { %1509 = vsyncadd (%p1820_p4), [#allocation9], 4294965248  ;;  %s225_s11 = smul.u32 24, %s1534_s21  ;;  %s218_s13 = sand.u32 1, %s1526_s19  }
  0x50   : > { %s952_s7 = sshll.u32 %s218_s13, 4 }
  0x51   : > { %s227_s15 = scalar_lea.vmem %s1802_s0, %s225_s11  ;;  %s1720_s16 = scalar_lea.vmem [#allocation10], %s952_s7 }
  0x52   : > { %v260_v0 = vld [vmem:[%s227_s15] sm:$0xff]  ;;  %v1718_v1 = vld [vmem:[%s227_s15 + $0x8] sm:$0xff] }
  0x53   : > { %271 = vsyncadd [#allocation4], 256  ;;  %v1722_v2 = vld [vmem:[%s227_s15 + $0x2] sm:$0xff]  ;;  %v1724_v3 = vld [vmem:[%s227_s15 + $0xa] sm:$0xff] }
  0x54   : > { %319 = vsyncadd [#allocation4 + $0x1], 256  ;;  %v1726_v4 = vld [vmem:[%s227_s15 + $0x4] sm:$0xff]  ;;  %v1728_v5 = vld [vmem:[%s227_s15 + $0xc] sm:$0xff] }
  0x55   : > { %367 = vsyncadd [#allocation4 + $0x2], 256 }
  0x56   : > { %1510 = dma.done.wait [#allocation4], 256 }
  0x57   : > { %1511 = vsyncadd [#allocation4], 4294967040 }
  0x58   : > { %1512 = dma.done.wait [#allocation4 + $0x1], 256 }
  0x59   : > { %1513 = vsyncadd [#allocation4 + $0x1], 4294967040 }
  0x5a   : > { %1514 = dma.done.wait [#allocation4 + $0x2], 256 }
  0x5b   : > { %1515 = vsyncadd [#allocation4 + $0x2], 4294967040  ;;  %1109 = vmatprep.mubr.f32.mxu0 %v1722_v2  ;;  %1074 = vmatprep.mubr.f32.mxu1 %v260_v0  ;;  %v475_v6 = vld [vmem:[#allocation5 + $0x80] sm:$0xff]  ;;  %v476_v7 = vld [vmem:[#allocation5 + $0x88] sm:$0xff]  ;;  %s969_s27 = sshll.u32 %s1534_s21, 8  ;;  %s803_s29 = sshll.u32 %s1720_s16, 4  ;;  %s1749_s29 = int_to_ptr.vmem [resolvable:$true] %s803_s29 }
  0x5c   : > { %v477_v8 = vld [vmem:[#allocation5 + $0x90] sm:$0xff]  ;;  %v1214_v9 = vpack.c.bf16 %v476_v7, %v475_v6  ;;  %v478_v10 = vld [vmem:[#allocation5 + $0x98] sm:$0xff]  ;;  %v479_v12 = vld [vmem:[#allocation5 + $0xa0] sm:$0xff]  ;;  %s1747_s14 = scalar_lea.hbm %s1807_s5, %s969_s27  ;;  %s1756_s21 = scalar_lea.sflag [#allocation7], %s218_s13 }
  0x5d   : > { %v1218_v11 = vpack.c.bf16 %v478_v10, %v477_v8  ;;  %v480_v13 = vld [vmem:[#allocation5 + $0xa8] sm:$0xff]  ;;  %v377_v15 = vld [vmem:[#allocation5] sm:$0xff]  ;;  %v481_v17 = vld [vmem:[#allocation5 + $0xb0] sm:$0xff]  ;;  %s1450_s11 = scalar_lea.vmem %s1749_s29, 256  ;;  %p1821_p1 = scmp.ne.s32.totalorder %s1814_s28, 0 }
  0x5e   : > { %1215 = vmatprep.subr.bf16.mxu0 %v1214_v9  ;;  %v1222_v14 = vpack.c.bf16 %v480_v13, %v479_v12  ;;  %v378_v16 = vld [vmem:[#allocation5 + $0x8] sm:$0xff]  ;;  %v482_v18 = vld [vmem:[#allocation5 + $0xb8] sm:$0xff]  ;;  %v379_v20 = vld [vmem:[#allocation5 + $0x10] sm:$0xff]  ;;  %p1451_p13 = scmp.ne.s32.totalorder %s1749_s29, %s1450_s11  ;;  %s1548_s7 = smov [#allocation10]  }
  0x5f   : > { %1217 = vmatpush3.bf16.msra.mxu0 %v1214_v9  ;;  %v1182_v19 = vpack.c.bf16 %v378_v16, %v377_v15  ;;  %v380_v21 = vld [vmem:[#allocation5 + $0x18] sm:$0xff]  ;;  %v381_v23 = vld [vmem:[#allocation5 + $0x20] sm:$0xff]  ;;  %v382_v24 = vld [vmem:[#allocation5 + $0x28] sm:$0xff]  ;;  %v1226_v25 = vpack.c.bf16 %v482_v18, %v481_v17  ;;  %s1454_s9 = sshll.u32 %s1548_s7, 4  ;;  %s1455_s9 = int_to_ptr.vmem [resolvable:$false] %s1454_s9 }
  0x60   : > { %1219 = vmatprep.subr.bf16.mxu0 %v1218_v11  ;;  %v1186_v22 = vpack.c.bf16 %v380_v21, %v379_v20  ;;  %v483_v26 = vld [vmem:[#allocation5 + $0xc0] sm:$0xff]  ;;  %v484_v27 = vld [vmem:[#allocation5 + $0xc8] sm:$0xff]  ;;  %v1190_v28 = vpack.c.bf16 %v382_v24, %v381_v23  ;;  %v383_v29 = vld [vmem:[#allocation5 + $0x30] sm:$0xff]  ;;  %p1452_p8 = pnand %p1451_p13, %p1821_p1  ;;  %s1456_s12 = scalar_lea.vmem %s1455_s9, 512 }
  0x61   : > { %1183 = vmatprep.subr.bf16.mxu1 %v1182_v19  ;;  %v384_v30 = vld [vmem:[#allocation5 + $0x38] sm:$0xff]  ;;  %v1230_v31 = vpack.c.bf16 %v484_v27, %v483_v26  ;;  %v485_v32 = vld [vmem:[#allocation5 + $0xd0] sm:$0xff]  ;;  %v385_v35 = vld [vmem:[#allocation5 + $0x40] sm:$0xff]  ;;  %p1457_p11 = scmp.lt.s32.totalorder %s1749_s29, %s1455_s9  ;;  %p1458_p2 = scmp.lt.s32.totalorder %s1456_s12, %s1450_s11 }
  0x62   : > { %1185 = vmatpush3.bf16.msra.mxu1 %v1182_v19  ;;  %v486_v33 = vld [vmem:[#allocation5 + $0xd8] sm:$0xff]  ;;  %v1194_v34 = vpack.c.bf16 %v384_v30, %v383_v29  ;;  %v386_v36 = vld [vmem:[#allocation5 + $0x48] sm:$0xff]  ;;  %v487_v38 = vld [vmem:[#allocation5 + $0xe0] sm:$0xff]  ;;  %p1453_p10 = pneg %p1452_p8 }
  0x63   : > { %1221 = vmatpush3.bf16.msra.mxu0 %v1218_v11  ;;  %1187 = vmatprep.subr.bf16.mxu1 %v1186_v22  ;;  %v1234_v37 = vpack.c.bf16 %v486_v33, %v485_v32  ;;  %v488_v39 = vld [vmem:[#allocation5 + $0xe8] sm:$0xff]  ;;  %v1198_v40 = vpack.c.bf16 %v386_v36, %v385_v35  ;;  %v387_v41 = vld [vmem:[#allocation5 + $0x50] sm:$0xff]  ;;  %v388_v42 = vld [vmem:[#allocation5 + $0x58] sm:$0xff]  ;;  %p1459_p3 = por %p1458_p2, %p1457_p11 }
  0x64   : > { %1223 = vmatprep.subr.bf16.mxu0 %v1222_v14  ;;  %v1238_v43 = vpack.c.bf16 %v488_v39, %v487_v38  ;;  %v489_v44 = vld [vmem:[#allocation5 + $0xf0] sm:$0xff]  ;;  %v490_v45 = vld [vmem:[#allocation5 + $0xf8] sm:$0xff]  ;;  %v1202_v46 = vpack.c.bf16 %v388_v42, %v387_v41  ;;  %v389_v47 = vld [vmem:[#allocation5 + $0x60] sm:$0xff] }
  0x65   : > { %v390_v48 = vld [vmem:[#allocation5 + $0x68] sm:$0xff]  ;;  %v1242_v49 = vpack.c.bf16 %v490_v45, %v489_v44  ;;  %v575_v50 = vld [vmem:[#allocation5 + $0x100] sm:$0xff]  ;;  %v391_v53 = vld [vmem:[#allocation5 + $0x70] sm:$0xff]  ;;  %p1460_p5 = pnand %p1459_p3, %p1453_p10 }
  0x66   : > { %1189 = vmatpush3.bf16.msra.mxu1 %v1186_v22  ;;  %v576_v51 = vld [vmem:[#allocation5 + $0x108] sm:$0xff]  ;;  %v1206_v52 = vpack.c.bf16 %v390_v48, %v389_v47  ;;  %v392_v54 = vld [vmem:[#allocation5 + $0x78] sm:$0xff]  ;;  %v577_v56 = vld [vmem:[#allocation5 + $0x110] sm:$0xff] }
  0x67   : > { %1225 = vmatpush3.bf16.msra.mxu0 %v1222_v14  ;;  %1191 = vmatprep.subr.bf16.mxu1 %v1190_v28  ;;  %v1246_v55 = vpack.c.bf16 %v576_v51, %v575_v50  ;;  %v578_v57 = vld [vmem:[#allocation5 + $0x118] sm:$0xff]  ;;  %v1210_v58 = vpack.c.bf16 %v392_v54, %v391_v53  ;;  %v683_v59 = vld [vmem:[#allocation8] sm:$0xff]  ;;  %v684_v60 = vld [vmem:[#allocation8 + $0x8] sm:$0xff] }
  0x68   : > { %1227 = vmatprep.subr.bf16.mxu0 %v1226_v25  ;;  %v1250_v61 = vpack.c.bf16 %v578_v57, %v577_v56  ;;  %v579_v62 = vld [vmem:[#allocation5 + $0x120] sm:$0xff]  ;;  %v580_v63 = vld [vmem:[#allocation5 + $0x128] sm:$0xff]  ;;  %v1278_v0 = vpack.c.bf16 %v684_v60, %v683_v59  ;;  %v685_v6 = vld [vmem:[#allocation8 + $0x10] sm:$0xff] }
  0x69   : > { %v686_v7 = vld [vmem:[#allocation8 + $0x18] sm:$0xff]  ;;  %v1254_v8 = vpack.c.bf16 %v580_v63, %v579_v62  ;;  %v581_v9 = vld [vmem:[#allocation5 + $0x130] sm:$0xff]  ;;  %v687_v12 = vld [vmem:[#allocation8 + $0x20] sm:$0xff] }
  0x6a   : > { %1193 = vmatpush3.bf16.msra.mxu1 %v1190_v28  ;;  %v582_v10 = vld [vmem:[#allocation5 + $0x138] sm:$0xff]  ;;  %v1282_v11 = vpack.c.bf16 %v686_v7, %v685_v6  ;;  %v688_v13 = vld [vmem:[#allocation8 + $0x28] sm:$0xff]  ;;  %v583_v15 = vld [vmem:[#allocation5 + $0x140] sm:$0xff] }
  0x6b   : > { %1229 = vmatpush3.bf16.msra.mxu0 %v1226_v25  ;;  %1195 = vmatprep.subr.bf16.mxu1 %v1194_v34  ;;  %v1258_v14 = vpack.c.bf16 %v582_v10, %v581_v9  ;;  %v584_v16 = vld [vmem:[#allocation5 + $0x148] sm:$0xff]  ;;  %v1286_v17 = vpack.c.bf16 %v688_v13, %v687_v12  ;;  %v690_v18 = vld [vmem:[#allocation8 + $0x38] sm:$0xff]  ;;  %v585_v20 = vld [vmem:[#allocation5 + $0x150] sm:$0xff] }
  0x6c   : > { %1231 = vmatprep.subr.bf16.mxu0 %v1230_v31  ;;  %v1262_v19 = vpack.c.bf16 %v584_v16, %v583_v15  ;;  %v586_v21 = vld [vmem:[#allocation5 + $0x158] sm:$0xff]  ;;  %v691_v23 = vld [vmem:[#allocation8 + $0x40] sm:$0xff]  ;;  %v692_v24 = vld [vmem:[#allocation8 + $0x48] sm:$0xff] }
  0x6d   : > { %v587_v25 = vld [vmem:[#allocation5 + $0x160] sm:$0xff]  ;;  %v588_v26 = vld [vmem:[#allocation5 + $0x168] sm:$0xff]  ;;  %v1294_v27 = vpack.c.bf16 %v692_v24, %v691_v23  ;;  %v693_v28 = vld [vmem:[#allocation8 + $0x50] sm:$0xff] }
  0x6e   : > { %1197 = vmatpush3.bf16.msra.mxu1 %v1194_v34  ;;  %v694_v29 = vld [vmem:[#allocation8 + $0x58] sm:$0xff]  ;;  %v1270_v30 = vpack.c.bf16 %v588_v26, %v587_v25  ;;  %v695_v35 = vld [vmem:[#allocation8 + $0x60] sm:$0xff]  ;;  %v696_v36 = vld [vmem:[#allocation8 + $0x68] sm:$0xff] }
  0x6f   : > { %1233 = vmatpush3.bf16.msra.mxu0 %v1230_v31  ;;  %1199 = vmatprep.subr.bf16.mxu1 %v1198_v40  ;;  %v589_v31 = vld [vmem:[#allocation5 + $0x170] sm:$0xff]  ;;  %v590_v32 = vld [vmem:[#allocation5 + $0x178] sm:$0xff]  ;;  %v1298_v33 = vpack.c.bf16 %v694_v29, %v693_v28  ;;  %v959_v44 = vld [vmem:[%s1804_s2] ss:$0 sm:$0xff] }
  0x70   : > { %1235 = vmatprep.subr.bf16.mxu0 %v1234_v37  ;;  %v1274_v34 = vpack.c.bf16 %v590_v32, %v589_v31  ;;  %v697_v38 = vld [vmem:[#allocation8 + $0x70] sm:$0xff]  ;;  %v698_v39 = vld [vmem:[#allocation8 + $0x78] sm:$0xff]  ;;  %v960_v51 = vld [vmem:[%s1806_s4] ss:$0 sm:$0xff] }
  0x72   : > { %1201 = vmatpush3.bf16.msra.mxu1 %v1198_v40  ;;  %v1306_v40 = vpack.c.bf16 %v698_v39, %v697_v38 }
  0x73   : > { %1237 = vmatpush3.bf16.msra.mxu0 %v1234_v37  ;;  %1203 = vmatprep.subr.bf16.mxu1 %v1202_v46  ;;  %v1302_v37 = vpack.c.bf16 %v696_v36, %v695_v35 }
  0x74   : > { %1239 = vmatprep.subr.bf16.mxu0 %v1238_v43 }
  0x76   : > { %1205 = vmatpush3.bf16.msra.mxu1 %v1202_v46 }
  0x77   : > { %1241 = vmatpush3.bf16.msra.mxu0 %v1238_v43  ;;  %1207 = vmatprep.subr.bf16.mxu1 %v1206_v52 }
  0x78   : > { %1243 = vmatprep.subr.bf16.mxu0 %v1242_v49 }
  0x7a   : > { %1209 = vmatpush3.bf16.msra.mxu1 %v1206_v52 }
  0x7b   : > { %1245 = vmatpush3.bf16.msra.mxu0 %v1242_v49  ;;  %1211 = vmatprep.subr.bf16.mxu1 %v1210_v58 }
  0x7c   : > { %1247 = vmatprep.subr.bf16.mxu0 %v1246_v55 }
  0x7e   : > { %1110 = vmatmul.mubr.f32.vlgmr.msra.gmra.mrb[0].mxu0 %v1724_v3  ;;  %1213 = vmatpush3.bf16.msra.mxu1 %v1210_v58 }
  0x7f   : > { %1249 = vmatpush3.bf16.msra.mxu0 %v1246_v55  ;;  %1144 = vmatprep.mubr.f32.mxu0 %v1726_v4  ;;  %v689_v4 = vld [vmem:[#allocation8 + $0x30] sm:$0xff] }
  0x80   : > { %1251 = vmatprep.subr.bf16.mxu0 %v1250_v61  ;;  %1279 = vmatprep.subr.bf16.mxu1 %v1278_v0  ;;  %v1290_v22 = vpack.c.bf16 %v690_v18, %v689_v4 }
  0x81   : > { %1075 = vmatmul.mubr.f32.vlgmr.msra.gmra.mrb[0].mxu1 %v1718_v1  ;;  %v1266_v1 = vpack.c.bf16 %v586_v21, %v585_v20 }
  0x82   : > { %1281 = vmatpush3.bf16.msra.mxu1 %v1278_v0 }
  0x83   : > { %1253 = vmatpush3.bf16.msra.mxu0 %v1250_v61  ;;  %1283 = vmatprep.subr.bf16.mxu1 %v1282_v11 }
  0x84   : > { %1255 = vmatprep.subr.bf16.mxu0 %v1254_v8 }
  0x86   : > { %1285 = vmatpush3.bf16.msra.mxu1 %v1282_v11 }
  0x87   : > { %1257 = vmatpush3.bf16.msra.mxu0 %v1254_v8  ;;  %1287 = vmatprep.subr.bf16.mxu1 %v1286_v17 }
  0x88   : > { %1259 = vmatprep.subr.bf16.mxu0 %v1258_v14 }
  0x8a   : > { %1289 = vmatpush3.bf16.msra.mxu1 %v1286_v17 }
  0x8b   : > { %1261 = vmatpush3.bf16.msra.mxu0 %v1258_v14  ;;  %1291 = vmatprep.subr.bf16.mxu1 %v1290_v22 }
  0x8c   : > { %1263 = vmatprep.subr.bf16.mxu0 %v1262_v19 }
  0x8e   : > { %1293 = vmatpush3.bf16.msra.mxu1 %v1290_v22 }
  0x8f   : > { %1265 = vmatpush3.bf16.msra.mxu0 %v1262_v19  ;;  %1295 = vmatprep.subr.bf16.mxu1 %v1294_v27 }
  0x90   : > { %1267 = vmatprep.subr.bf16.mxu0 %v1266_v1 }
  0x92   : > { %1297 = vmatpush3.bf16.msra.mxu1 %v1294_v27 }
  0x93   : > { %1269 = vmatpush3.bf16.msra.mxu0 %v1266_v1  ;;  %1299 = vmatprep.subr.bf16.mxu1 %v1298_v33 }
  0x94   : > { %1271 = vmatprep.subr.bf16.mxu0 %v1270_v30 }
  0x96   : > { %1301 = vmatpush3.bf16.msra.mxu1 %v1298_v33 }
  0x97   : > { %1273 = vmatpush3.bf16.msra.mxu0 %v1270_v30  ;;  %1303 = vmatprep.subr.bf16.mxu1 %v1302_v37 }
  0x98   : > { %1275 = vmatprep.subr.bf16.mxu0 %v1274_v34 }
  0x9a   : > { %1305 = vmatpush3.bf16.msra.mxu1 %v1302_v37 }
  0x9b   : > { %1277 = vmatpush3.bf16.msra.mxu0 %v1274_v34  ;;  %1307 = vmatprep.subr.bf16.mxu1 %v1306_v40 }
  0x9e   : > { %1145 = vmatmul.mubr.f32.vlgmr.msra.gmra.mrb[0].mxu0 %v1728_v5  ;;  %1309 = vmatpush3.bf16.msra.mxu1 %v1306_v40 }
 0x154   : > { %v1076_v41 = vpop.f32.mrb[0].mxu1 }
 0x155   : > { %v459_v42 = vpop.f32.mrb[1].mxu1 }
 0x171   : > { %v1146_v43 = vpop.f32.mrb[0].mxu0 }
 0x172   : > { %v1310_v5 = vadd.f32 %v1146_v43, %v1076_v41  ;;  %v657_v45 = vpop.f32.mrb[1].mxu0 }
 0x173   : > { %v1311_v46 = vadd.f32 %v657_v45, %v459_v42 }
 0x174   : > { %v680_v47 = vadd.f32 %v1310_v5, %v959_v44 }
 0x175   : > { %v679_v48 = vadd.f32 %v1311_v46, %v959_v44 }
 0x176   : > { %v682_v50 = vmax.f32 %v680_v47, 0.0 }
 0x177   : > { %v681_v49 = vmax.f32 %v679_v48, 0.0 }
 0x179   : > { %1179 = vmatprep.mubr.f32.mxu1 %v681_v49 }
 0x17a   : > { %1180 = vmatmul.mubr.f32.vlgmr.msra.gmra.mrb[2].mxu1 %v682_v50 }
 0x24d   : > { %v1181_v52 = vpop.f32.mrb[2].mxu1 }
 0x24e   : > { %v778_v53 = vadd.f32 %v1181_v52, %v960_v51  ;;  %v772_v54 = vpop.f32.mrb[3].mxu1 }
 0x24f   : > { %v773_v55 = vadd.f32 %v960_v51, %v772_v54 }
 0x250   : > { %v784_v56 = vadd.f32 %v1724_v3, %v778_v53 }
 0x251   : > { %v783_v57 = vadd.f32 %v1722_v2, %v773_v55 }
 0x252   : > { %786 = vst [vmem:[%s1720_s16 + $0x8] sm:$0xff] %v784_v56 }
 0x253   : > { %785 = vst [vmem:[%s1720_s16] sm:$0xff] %v783_v57 }
 0x254   : > { %1463 = shalt.err (!%p1460_p5)
}
 0x255   : > { %s1464_s13 = scalar_lea.hbm %s1747_s14, 256  ;;  %s1468_s8 = scalar_lea.hbm %s1807_s5, 512 }
 0x256   : > { %p1465_p6 = scmp.ne.s32.totalorder %s1747_s14, %s1464_s13  ;;  %p1469_p12 = scmp.lt.u32.totalorder %s1747_s14, %s1807_s5 }
 0x257   : > { %p1470_p0 = scmp.lt.u32.totalorder %s1468_s8, %s1464_s13  ;;  %p1472_p13 = scmp.lt.u32.totalorder %s1464_s13, %s1747_s14 }
 0x258   : > { %p1466_p7 = pnand %p1465_p6, %p1821_p1 }
 0x259   : > { %p1471_p4 = por %p1470_p0, %p1469_p12 }
 0x25a   : > { %p1467_p9 = pneg %p1466_p7 }
 0x25b   : > { %p1473_p8 = por %p1472_p13, %p1471_p4 }
 0x25d   : > { %p1474_p10 = pnand %p1473_p8, %p1467_p9 }
 0x25f   : > { %1477 = shalt.err (!%p1474_p10)
}
 0x260   : > { %s1549_s25 = smov 128   ;;  %s1550_s27 = smov 8  }
 0x261   : > { %1322 = dma.vmem_to_hbm [thread:$0]  (%p1821_p1), %s1749_s29, 256, %s1747_s14, %s1756_s21, %s1549_s25, %s1549_s25, %s1550_s27  }
 0x262 PF: > { %p1339_p11 = scmp.ge.s32.totalorder %s1542_s23, 2  ;;  %s818_s10 = sand.u32 1, %s1522_s18  }
 0x263   : > { %p1822_p2 = scmp.ne.s32.totalorder %s1815_s30, 0  ;;  %s819_s26 = scalar_lea.sflag [#allocation7], %s818_s10 }
 0x265   : > { %p1332_p3 = pnand %p1339_p11, %p1822_p2 }
 0x267   : > { %1517 = dma.done.wait (!%p1332_p3), %s819_s26, 256  }
 0x268   : > { %1519 = vsyncadd (!%p1332_p3), %s819_s26, 4294967040  ;;  %s20_s23 = sadd.s32 1, %s1542_s23   ;;  %s1823_s28 = sld [smem:[#allocation20_spill]] }
 0x269   : > { %p17_p5 = scmp.ge.s32.totalorder %s20_s23, 4   ;;  %s1824_s18 = smov %s1526_s19 }
 0x26a   : > { %s1825_s19 = smov %s1530_s20  ;;  %s1826_s20 = smov %s1634_s6 }
 0x26b   : > { %s1827_s21 = smov %s1538_s22  ;;  %19 = sbr.rel (!%p17_p5) target bundleno = 6 (0x6), region = 214 }
 0x26e   : > { %s1828_s22 = smov %s1823_s28 }
 0x272   :  { %824 = vsyncpa [#allocation6], 1 }
 0x273   :  { %826 = vsyncpa [#allocation6 + $0x1], 1 }
 0x274   :  { %827 = vsyncpa [#allocation9], 1 }
 0x275   :  { %828 = vsyncpa [#allocation7], 1 }
 0x276   :  { %830 = vsyncpa [#allocation7 + $0x1], 1 }
 0x277   :  { %831 = vsyncmov [#allocation4] }
 0x27a   :  { %s832_s30 = vpop.sfrf %831 }
 0x27b   :  { %p966_p1 = scmp.ne.s32.totalorder %s832_s30, 0 }
 0x27d   :  { %836 = shalt.err (%p966_p1)  }
 0x27e   :  { %838 = vsyncmov [#allocation4 + $0x1] }
 0x281   :  { %s839_s29 = vpop.sfrf %838 }
 0x282   :  { %p967_p6 = scmp.ne.s32.totalorder %s839_s29, 0 }
 0x284   :  { %843 = shalt.err (%p967_p6)  }
 0x285   :  { %845 = vsyncmov [#allocation4 + $0x2] }
 0x288   :  { %s846_s6 = vpop.sfrf %845 }
 0x289   :  { %p968_p7 = scmp.ne.s32.totalorder %s846_s6, 0 }
 0x28b   :  { %850 = shalt.err (%p968_p7)  }

</bundles_post_ra>
